<compile_context>
chip_gen: v7x
topology: tpu7x:2x2x1
jax: 0.10.0
libtpu: 0.0.40
codegen_flags: <defaults>
</compile_context>

<pallas_src>
import functools
import math

import jax
import jax.numpy as jnp
import numpy as np
from jax.experimental import pallas as pl
from jax.experimental.pallas import tpu as pltpu


# ----------------------------- Pallas kernel ------------------------------ #
def _upsample_stage_kernel(x_ref, w_ref, b_ref, a_ref, o_ref, xpad_ref, *,
                           H, WC, apply_prelu):
    # x_ref   : (1, H, W*C)       one batch element, lane-dense NHWC (VMEM)
    # w_ref   : (3, W*C, CoutL)   banded conv weights, CoutL = r*W*r*C,
    #                             output columns ordered (i, w, j, c)
    # b_ref   : (1, CoutL)        bias in the same column order
    # a_ref   : (1,)              PReLU alpha (SMEM scalar)
    # o_ref   : (1, H, CoutL)     lane-dense, already pixel-shuffled output
    # xpad_ref: (H+2, W*C)        VMEM scratch, vertical zero halo only

    # Halo-only zeroing (horizontal padding is folded into the banded weight).
    zero_row = jnp.zeros((1, WC), xpad_ref.dtype)
    xpad_ref[0:1, :] = zero_row
    xpad_ref[H + 1:H + 2, :] = zero_row
    xpad_ref[1:H + 1, :] = x_ref[0]

    # 3x3 conv == three (H, W*C) @ (W*C, CoutL) matmuls, one per kh; the kw
    # taps + horizontal zero padding live in the band structure of w_ref[kh].
    acc = jnp.dot(xpad_ref[0:H, :], w_ref[0],
                  preferred_element_type=jnp.float32)
    acc = acc + jnp.dot(xpad_ref[1:H + 1, :], w_ref[1],
                        preferred_element_type=jnp.float32)
    acc = acc + jnp.dot(xpad_ref[2:H + 2, :], w_ref[2],
                        preferred_element_type=jnp.float32)
    acc = acc + b_ref[0].astype(jnp.float32)

    if apply_prelu:
        # Single shared alpha commutes with the pixel-shuffle permutation.
        alpha = a_ref[0]
        acc = jnp.where(acc >= 0, acc, alpha * acc)

    # Columns are ordered (i, w, j, c), so the (H, r*W*r*C) row-major result
    # IS the pixel-shuffled (H*r, W*r*C) image: one dense 256-lane store;
    # the shuffle completes with a free reshape in the wrapper.
    o_ref[0] = acc.astype(o_ref.dtype)


def upsample_stage(x_ld, w_banded, b_cols, alpha, r, *, H, W, C, apply_prelu):
    """Conv3x3(same)+bias [+PReLU] + PixelShuffle(r), fused in one pallas_call.

    x_ld: lane-dense (N, H, W*C)  ->  returns lane-dense (N, H*r, W*r*C).
    """
    N = x_ld.shape[0]
    WC = W * C
    CoutL = r * W * r * C
    assert w_banded.shape == (3, WC, CoutL)

    kern = functools.partial(_upsample_stage_kernel, H=H, WC=WC,
                             apply_prelu=apply_prelu)
    out = pl.pallas_call(
        kern,
        out_shape=jax.ShapeDtypeStruct((N, H, CoutL), x_ld.dtype),
        grid_spec=pltpu.PrefetchScalarGridSpec(
            num_scalar_prefetch=0,
            grid=(N,),
            in_specs=[
                pl.BlockSpec((1, H, WC), lambda n: (n, 0, 0)),
                # Constant block indices: weights/bias are not re-DMA'd per step.
                pl.BlockSpec((3, WC, CoutL), lambda n: (0, 0, 0)),
                pl.BlockSpec((1, CoutL), lambda n: (0, 0)),
                pl.BlockSpec(memory_space=pltpu.MemorySpace.SMEM),  # alpha
            ],
            out_specs=pl.BlockSpec((1, H, CoutL), lambda n: (n, 0, 0)),
            scratch_shapes=[pltpu.VMEM((H + 2, WC), x_ld.dtype)],
        ),
        compiler_params=pltpu.CompilerParams(
            dimension_semantics=("parallel",)),
    )(x_ld, w_banded, b_cols.reshape(1, CoutL), alpha)
    # (N, H, r*W*r*C) and (N, H*r, W*r*C) share the same row-major layout:
    # the pixel shuffle is finished by this free reshape.
    return out.reshape(N, H * r, W * r * C)


# ------------------------ kernel-ready weight prep ------------------------- #
def make_banded_weight(w_oihw, r, W):
    """(Cout, Cin, 3, 3) torch conv weight -> (3, W*Cin, r*W*r*Cin) banded
    matrices B[kh] with
        conv[h, (i,w,j,c)] = sum_kh  xpad_row[h+kh, :] @ B[kh]
    where co = c*r*r + i*r + j (torch PixelShuffle order).  Output columns are
    ordered (i, w, j, c) so the matmul result is already pixel-shuffled;
    horizontal zero padding is encoded by dropping out-of-range band entries."""
    Cout, C, _, _ = w_oihw.shape
    assert Cout == r * r * C
    # k_small[kh, kw, ci, i, j, c] = w_oihw[c*r*r + i*r + j, ci, kh, kw]
    k6 = w_oihw.reshape(C, r, r, C, 3, 3)                # (c, i, j, ci, kh, kw)
    k_small = jnp.transpose(k6, (4, 5, 3, 1, 2, 0))      # (kh, kw, ci, i, j, c)
    # band[kw, q, w] = 1  iff  q == w + kw - 1  (out-of-range taps -> zero pad)
    band = np.zeros((3, W, W), np.float32)
    for kw in range(3):
        for w in range(W):
            q = w + kw - 1
            if 0 <= q < W:
                band[kw, q, w] = 1.0
    band = jnp.asarray(band, w_oihw.dtype)
    # B[kh, q, ci, i, w, j, c]
    B = jnp.einsum('kqw,hkmijc->hqmiwjc', band, k_small)
    return B.reshape(3, W * C, r * W * r * C)


def make_bias_cols(b, r, W, C):
    """(Cout,) torch bias (co = c*r*r + i*r + j) -> (r*W*r*C,) vector in the
    kernel's (i, w, j, c) column order."""
    b_ijc = jnp.transpose(b.reshape(C, r, r), (1, 2, 0))     # (i, j, c)
    return jnp.broadcast_to(b_ijc[:, None, :, :], (r, W, r, C)).reshape(-1)


# -------------------------- Upsampler forward ----------------------------- #
def upsampler_forward(x_nchw, params):
    """Equivalent of Upsampler.forward. Input/output layout: NCHW."""
    N, C, H, W = x_nchw.shape
    # NCHW -> lane-dense NHWC (N, H, W*C); the reshape is free.
    x = jnp.transpose(x_nchw, (0, 2, 3, 1)).reshape(N, H, W * C)
    stages = params["stages"]
    alpha = params["alpha"]
    for s, st in enumerate(stages):
        r = st["r"]
        last = s == len(stages) - 1
        w_banded = make_banded_weight(st["w_oihw"], r, W)
        b_cols = make_bias_cols(st["b"], r, W, C)
        # Final PReLU (shared alpha) is fused into the last stage's kernel.
        x = upsample_stage(x, w_banded, b_cols, alpha, r, H=H, W=W, C=C,
                           apply_prelu=last)
        H, W = H * r, W * r
    out = x.reshape(N, H, W, C)
    return jnp.transpose(out, (0, 3, 1, 2))          # -> NCHW


def init_upsampler_params(key, scale, n_feat, dtype=jnp.float32):
    """Deterministic synthetic parameters matching the torch module's shapes."""
    if scale == 3:
        stage_cfg = [3]
    else:
        stage_cfg = [2] * int(math.log(scale, 2))
    stages = []
    for r in stage_cfg:
        cout = r * r * n_feat
        key, kw_key, kb_key = jax.random.split(key, 3)
        # torch Conv2d weight (Cout, Cin, 3, 3) with Cout index = c*r*r + i*r + j
        w_oihw = jax.random.normal(kw_key, (cout, n_feat, 3, 3), dtype) * 0.1
        b = jax.random.normal(kb_key, (cout,), dtype) * 0.1
        stages.append(dict(r=r, w_oihw=w_oihw, b=b))
    alpha = jnp.full((1,), 0.5, dtype)   # PReLU(init=0.5), single shared param
    return {"stages": stages, "alpha": alpha}


# ------------------------- pure-JAX reference ------------------------------ #
def _pixel_shuffle_nhwc(y, r):
    # y: (N, H, W, C*r*r) with torch channel ordering c*r*r + i*r + j
    N, H, W, Crr = y.shape
    C = Crr // (r * r)
    y = y.reshape(N, H, W, C, r, r)
    y = jnp.transpose(y, (0, 1, 4, 2, 5, 3))         # (N, H, r, W, r, C)
    return y.reshape(N, H * r, W * r, C)


def _reference(x_nchw, params):
    x = jnp.transpose(x_nchw, (0, 2, 3, 1))
    for st in params["stages"]:
        w_hwio = jnp.transpose(st["w_oihw"], (2, 3, 1, 0))
        y = jax.lax.conv_general_dilated(
            x, w_hwio, window_strides=(1, 1), padding="SAME",
            dimension_numbers=("NHWC", "HWIO", "NHWC"))
        y = y + st["b"]
        x = _pixel_shuffle_nhwc(y, st["r"])
    a = params["alpha"][0]
    x = jnp.where(x >= 0, x, a * x)
    return jnp.transpose(x, (0, 3, 1, 2))


# --------------------------------- main ------------------------------------ #
if __name__ == "__main__":
    scale, n_feat = 2, 4
    N, H, W = 2, 16, 16

    key = jax.random.PRNGKey(0)
    key, kx = jax.random.split(key)
    x = jax.random.normal(kx, (N, n_feat, H, W), jnp.float32)   # NCHW input

    params = init_upsampler_params(key, scale, n_feat)

    out = upsampler_forward(x, params)
    out = jax.block_until_ready(out)

    ref = _reference(x, params)
    assert out.shape == (N, n_feat, H * scale, W * scale), out.shape
    assert jnp.allclose(out, ref, atol=2e-4, rtol=2e-4), "mismatch vs reference"

    print("KERNEL_OK")
</pallas_src>

<mosaic_0001>
module attributes {stable_mosaic.version = 11 : i64} {
  func.func @_upsample_stage_kernel(%arg0: i32, %arg1: memref<1x16x64xf32, #tpu.memory_space<vmem>>, %arg2: memref<3x64x256xf32, #tpu.memory_space<vmem>>, %arg3: memref<1x256xf32, #tpu.memory_space<vmem>>, %arg4: memref<1xf32, #tpu.memory_space<smem>>, %arg5: memref<1x16x256xf32, #tpu.memory_space<vmem>>, %arg6: memref<18x64xf32, #tpu.memory_space<vmem>>) attributes {dimension_semantics = [#tpu.dimension_semantics<parallel>], iteration_bounds = array<i64: 2>, scalar_prefetch = 0 : i64, scratch_operands = 1 : i64, tpu.core_type = #tpu.core_type<tc>, window_params = [{transform_indices = @transform_0, window_bounds = array<i64: 1, 16, 64>}, {pipeline_mode = #tpu.pipeline_mode<synchronous>, transform_indices = @transform_1, window_bounds = array<i64: 3, 64, 256>}, {pipeline_mode = #tpu.pipeline_mode<synchronous>, transform_indices = @transform_2, window_bounds = array<i64: 1, 256>}, {transform_indices = @transform_3, window_bounds = array<i64: 1>}, {transform_indices = @transform_4, window_bounds = array<i64: 1, 16, 256>}]} {
    %cst = arith.constant 0.000000e+00 : f32
    %0 = vector.broadcast %cst : f32 to vector<1x64xf32>
    %c0 = arith.constant 0 : index
    %c0_0 = arith.constant 0 : index
    %1 = vector.load %arg6[%c0, %c0_0] : memref<18x64xf32, #tpu.memory_space<vmem>>, vector<1x64xf32>
    tpu.vector_store %arg6[%c0, %c0_0], %0 {strides = array<i32>} : memref<18x64xf32, #tpu.memory_space<vmem>>, vector<1x64xf32>,
    %c17 = arith.constant 17 : index
    %c0_1 = arith.constant 0 : index
    %2 = vector.load %arg6[%c17, %c0_1] : memref<18x64xf32, #tpu.memory_space<vmem>>, vector<1x64xf32>
    tpu.vector_store %arg6[%c17, %c0_1], %0 {strides = array<i32>} : memref<18x64xf32, #tpu.memory_space<vmem>>, vector<1x64xf32>,
    %c0_2 = arith.constant 0 : index
    %c0_3 = arith.constant 0 : index
    %c0_4 = arith.constant 0 : index
    %3 = vector.load %arg1[%c0_2, %c0_3, %c0_4] : memref<1x16x64xf32, #tpu.memory_space<vmem>>, vector<1x16x64xf32>
    %4 = vector.shape_cast %3 : vector<1x16x64xf32> to vector<16x64xf32>
    %c1 = arith.constant 1 : index
    %c0_5 = arith.constant 0 : index
    %5 = vector.load %arg6[%c1, %c0_5] : memref<18x64xf32, #tpu.memory_space<vmem>>, vector<16x64xf32>
    tpu.vector_store %arg6[%c1, %c0_5], %4 {strides = array<i32>} : memref<18x64xf32, #tpu.memory_space<vmem>>, vector<16x64xf32>,
    %c0_6 = arith.constant 0 : index
    %c0_7 = arith.constant 0 : index
    %6 = vector.load %arg6[%c0_6, %c0_7] : memref<18x64xf32, #tpu.memory_space<vmem>>, vector<16x64xf32>
    %c0_8 = arith.constant 0 : index
    %c0_9 = arith.constant 0 : index
    %c0_10 = arith.constant 0 : index
    %7 = vector.load %arg2[%c0_8, %c0_9, %c0_10] : memref<3x64x256xf32, #tpu.memory_space<vmem>>, vector<1x64x256xf32>
    %8 = vector.shape_cast %7 : vector<1x64x256xf32> to vector<64x256xf32>
    %cst_11 = arith.constant dense<0.000000e+00> : vector<16x256xf32>
    %9 = tpu.matmul %6, %8, %cst_11 {dimension_numbers = #tpu.dot_dimension_numbers<[1], [0], [0], [1], [0, 0, 1, 1], [], []>} : vector<16x64xf32>, vector<64x256xf32>, vector<16x256xf32> -> vector<16x256xf32>
    %c1_12 = arith.constant 1 : index
    %c0_13 = arith.constant 0 : index
    %10 = vector.load %arg6[%c1_12, %c0_13] : memref<18x64xf32, #tpu.memory_space<vmem>>, vector<16x64xf32>
    %c1_14 = arith.constant 1 : index
    %c0_15 = arith.constant 0 : index
    %c0_16 = arith.constant 0 : index
    %11 = vector.load %arg2[%c1_14, %c0_15, %c0_16] : memref<3x64x256xf32, #tpu.memory_space<vmem>>, vector<1x64x256xf32>
    %12 = vector.shape_cast %11 : vector<1x64x256xf32> to vector<64x256xf32>
    %cst_17 = arith.constant dense<0.000000e+00> : vector<16x256xf32>
    %13 = tpu.matmul %10, %12, %cst_17 {dimension_numbers = #tpu.dot_dimension_numbers<[1], [0], [0], [1], [0, 0, 1, 1], [], []>} : vector<16x64xf32>, vector<64x256xf32>, vector<16x256xf32> -> vector<16x256xf32>
    %14 = arith.addf %9, %13 : vector<16x256xf32>
    %c2 = arith.constant 2 : index
    %c0_18 = arith.constant 0 : index
    %15 = vector.load %arg6[%c2, %c0_18] : memref<18x64xf32, #tpu.memory_space<vmem>>, vector<16x64xf32>
    %c2_19 = arith.constant 2 : index
    %c0_20 = arith.constant 0 : index
    %c0_21 = arith.constant 0 : index
    %16 = vector.load %arg2[%c2_19, %c0_20, %c0_21] : memref<3x64x256xf32, #tpu.memory_space<vmem>>, vector<1x64x256xf32>
    %17 = vector.shape_cast %16 : vector<1x64x256xf32> to vector<64x256xf32>
    %cst_22 = arith.constant dense<0.000000e+00> : vector<16x256xf32>
    %18 = tpu.matmul %15, %17, %cst_22 {dimension_numbers = #tpu.dot_dimension_numbers<[1], [0], [0], [1], [0, 0, 1, 1], [], []>} : vector<16x64xf32>, vector<64x256xf32>, vector<16x256xf32> -> vector<16x256xf32>
    %19 = arith.addf %14, %18 : vector<16x256xf32>
    %c0_23 = arith.constant 0 : index
    %c0_24 = arith.constant 0 : index
    %20 = vector.load %arg3[%c0_23, %c0_24] : memref<1x256xf32, #tpu.memory_space<vmem>>, vector<1x256xf32>
    %21 = vector.shape_cast %20 : vector<1x256xf32> to vector<256xf32>
    %22 = vector.shape_cast %21 : vector<256xf32> to vector<1x256xf32>
    %23 = vector.broadcast %22 : vector<1x256xf32> to vector<16x256xf32>
    %24 = arith.addf %19, %23 : vector<16x256xf32>
    %c0_25 = arith.constant 0 : index
    %25 = memref.load %arg4[%c0_25] : memref<1xf32, #tpu.memory_space<smem>>
    %cst_26 = arith.constant 0.000000e+00 : f32
    %26 = vector.broadcast %cst_26 : f32 to vector<16x256xf32>
    %27 = arith.cmpf oge, %24, %26 : vector<16x256xf32>
    %28 = vector.broadcast %25 : f32 to vector<16x256xf32>
    %29 = arith.mulf %28, %24 : vector<16x256xf32>
    %30 = arith.select %27, %24, %29 : vector<16x256xi1>, vector<16x256xf32>
    %c0_27 = arith.constant 0 : index
    %c0_28 = arith.constant 0 : index
    %c0_29 = arith.constant 0 : index
    %31 = vector.load %arg5[%c0_27, %c0_28, %c0_29] : memref<1x16x256xf32, #tpu.memory_space<vmem>>, vector<1x16x256xf32>
    %32 = vector.shape_cast %31 : vector<1x16x256xf32> to vector<16x256xf32>
    %33 = vector.shape_cast %30 : vector<16x256xf32> to vector<1x16x256xf32>
    tpu.vector_store %arg5[%c0_27, %c0_28, %c0_29], %33 {strides = array<i32>} : memref<1x16x256xf32, #tpu.memory_space<vmem>>, vector<1x16x256xf32>,
    return
  }
  func.func @transform_0(%arg0: i32) -> (i32, i32, i32) {
    %c0_i32 = arith.constant 0 : i32
    %c0_i32_0 = arith.constant 0 : i32
    %c0_i32_1 = arith.constant 0 : i32
    return %arg0, %c0_i32, %c0_i32_0 : i32, i32, i32
  }
  func.func @transform_1(%arg0: i32) -> (i32, i32, i32) {
    %c0_i32 = arith.constant 0 : i32
    %c0_i32_0 = arith.constant 0 : i32
    %c0_i32_1 = arith.constant 0 : i32
    %c0_i32_2 = arith.constant 0 : i32
    return %c0_i32, %c0_i32_0, %c0_i32_1 : i32, i32, i32
  }
  func.func @transform_2(%arg0: i32) -> (i32, i32) {
    %c0_i32 = arith.constant 0 : i32
    %c0_i32_0 = arith.constant 0 : i32
    %c0_i32_1 = arith.constant 0 : i32
    return %c0_i32, %c0_i32_0 : i32, i32
  }
  func.func @transform_3(%arg0: i32) -> i32 {
    %c0_i32 = arith.constant 0 : i32
    %c0_i32_0 = arith.constant 0 : i32
    return %c0_i32 : i32
  }
  func.func @transform_4(%arg0: i32) -> (i32, i32, i32) {
    %c0_i32 = arith.constant 0 : i32
    %c0_i32_0 = arith.constant 0 : i32
    %c0_i32_1 = arith.constant 0 : i32
    return %arg0, %c0_i32, %c0_i32_0 : i32, i32, i32
  }
}

</mosaic_0001>

<bundles_post_ra>
// kernel: tpu_custom_call.1
= control target key start
LH: loop header
LB: loop body
LE: loop exit
PB: predicated region body
PF: predicated region fallthrough
CT: control target
= control target key end

     0   :  { %s1225_s0 = inlined_call_operand.hbm [shape: f32[2,16,64], index: 0, kind: input, shape index: {}]   ;;  %s1226_s1 = inlined_call_operand.hbm [shape: f32[3,64,256], index: 1, kind: input, shape index: {}]   ;;  %s1227_s2 = inlined_call_operand.vmem [shape: f32[1,256], index: 2, kind: input, shape index: {}]   ;;  %s1228_s3 = inlined_call_operand.<no memory space> [shape: f32[1], index: 3, kind: input, shape index: {}]   ;;  %s1229_s4 = inlined_call_operand.hbm [shape: f32[2,16,256], index: 4, kind: output, shape index: {}]  }
   0x1   :  { %9 = sst [smem:[#allocation3]] %s1228_s3 }
   0x2   :  { %10 = vsyncpa [#allocation5], 0 }
   0x3   :  { %12 = vsyncpa [#allocation5 + $0x1], 0 }
   0x4   :  { %13 = vsyncpa [#allocation8], 0 }
   0x5   :  { %14 = vsyncpa [#allocation6], 0 }
   0x6   :  { %16 = vsyncpa [#allocation6 + $0x1], 0  ;;  %s1000_s17 = smov 0   ;;  %s1002_s18 = smov 0  }
   0x7   :  { %s1004_s19 = smov 0   ;;  %s1006_s20 = smov 0  }
   0x8 LB: > { %s1021_s3 = sadd.s32 4294967295, %s960_s20   ;;  %s680_s21 = sadd.s32 4294967294, %s960_s20   ;;  %s960_s20 = sphi %s1006_s20, %s1249_s20   ;;  %s956_s19 = sphi %s1004_s19, %s1248_s19   ;;  %s952_s18 = sphi %s1002_s18, %s1247_s18   ;;  %s948_s17 = sphi %s1000_s17, %s1246_s17  }
   0x9   : > { %p42_p0 = scmp.ne.s32.totalorder %s952_s18, %s948_s17  ;;  %p1230_p1 = scmp.eq.s32.totalorder %s1021_s3, 0 }
   0xa   : > { %p135_p3 = scmp.eq.s32.totalorder %s680_s21, 1  ;;  %p681_p5 = scmp.ge.s32.totalorder %s960_s20, 1 }
   0xb   : > { %p1030_p4 = por %p1230_p1, %p42_p0  ;;  %p142_p7 = scmp.lt.s32.totalorder %s960_s20, 3 }
   0xc   : > { %p1035_p6 = por %p135_p3, %p42_p0  ;;  %s962_s25 = smov [#allocation7]  }
   0xd   : > { %s1233_s22 = scalar_select %p1030_p4, 1, 0 }
   0xe   : > { %s1234_s23 = scalar_select %p1035_p6, 1, 0 }
   0xf   : > { %p1040_p8 = pnand %p681_p5, %p142_p7  ;;  %s154_s26 = sshll.u32 %s962_s25, 4  ;;  %s1044_s26 = int_to_ptr.vmem [resolvable:$true] %s154_s26 }
  0x10   : > { %s1056_s28 = sadd.s32 1, %s960_s20   ;;  %s29_s29 = sadd.s32 1, %s956_s19 }
  0x11   : > { %s1235_s24 = scalar_select %p1040_p8, 1, 0 }
  0x12   : > { %p776_p9 = pneg %p1040_p8  ;;  %s26_s30 = ssub.s32 %s960_s20, %s1056_s28 }
  0x13   : > { %s832_s7 = scalar_lea.hbm %s1226_s1, 6144 }
  0x14   : > { %p1051_p11 = pnand %p776_p9, %p1230_p1  ;;  %p833_p12 = scmp.ne.s32.totalorder %s1226_s1, %s832_s7 }
  0x15   : > { %p839_p5 = scmp.lt.u32.totalorder %s832_s7, %s1226_s1 }
  0x16   : > { %p834_p13 = pneg %p1051_p11 }
  0x18   : > { %p835_p0 = pnand %p834_p13, %p833_p12 }
  0x1a   : > { %p836_p3 = pneg %p835_p0 }
  0x1c   : > { %p841_p7 = pnand %p839_p5, %p836_p3 }
  0x1e   : > { %844 = shalt.err (!%p841_p7)
}
  0x1f   : > { %s845_s12 = scalar_lea.vmem %s1044_s26, 6144  ;;  %p853_p2 = scmp.lt.s32.totalorder %s1044_s26, %s1044_s26 }
  0x20   : > { %p846_p9 = scmp.ne.s32.totalorder %s1044_s26, %s845_s12  ;;  %p854_p6 = scmp.lt.s32.totalorder %s845_s12, %s845_s12 }
  0x22   : > { %p848_p10 = pnand %p846_p9, %p834_p13  ;;  %p855_p4 = por %p854_p6, %p853_p2 }
  0x24   : > { %p849_p1 = pneg %p848_p10 }
  0x26   : > { %p856_p8 = pnand %p855_p4, %p849_p1 }
  0x28   : > { %859 = shalt.err (!%p856_p8)
}
  0x29   : > { %s963_s13 = smov 256   ;;  %s964_s14 = smov 16  }
  0x2a   : > { %779 = dma.hbm_to_vmem [thread:$0]  (!%p1051_p11), %s1226_s1, 6144, %s1044_s26, [#allocation8], %s963_s13, %s963_s13, %s964_s14  }
  0x2b   : > { %p27_p2 = scmp.eq.s32.totalorder %s26_s30, 0  ;;  %p36_p1 = scmp.ne.s32.totalorder %s956_s19, %s952_s18 }
  0x2c   : > { %p37_p4 = scmp.eq.s32.totalorder %s960_s20, 0  ;;  %p789_p6 = scmp.lt.s32.totalorder %s960_s20, 2 }
  0x2d   : > { %s1087_s21 = scalar_select %p27_p2, %s956_s19, %s29_s29  }
  0x2e   : > { %p38_p8 = por %p37_p4, %p36_p1  ;;  %p1237_p10 = scmp.eq.s32.totalorder %s1021_s3, 1 }
  0x2f   : > { %s174_s5 = sand.u32 1, %s956_s19   ;;  %s702_s6 = sshll.u32 %s960_s20, 8 }
  0x30   : > { %p1091_p12 = por %p1237_p10, %p36_p1  ;;  %s684_s7 = sshll.u32 %s174_s5, 4 }
  0x31   : > { %s1100_s9 = scalar_lea.hbm %s1225_s0, %s702_s6  ;;  %s178_s26 = scalar_lea.vmem [#allocation4], %s684_s7 }
  0x32   : > { %s185_s29 = sshll.u32 %s178_s26, 4  ;;  %p1102_p11 = pnand %p789_p6, %p38_p8  ;;  %s1106_s29 = int_to_ptr.vmem [resolvable:$true] %s185_s29 }
  0x33   : > { %s1108_s10 = scalar_lea.sflag [#allocation5], %s174_s5  ;;  %s860_s11 = scalar_lea.hbm %s1100_s9, 256 }
  0x34   : > { %p861_p13 = scmp.ne.s32.totalorder %s1100_s9, %s860_s11  ;;  %p862_p0 = pneg %p1102_p11 }
  0x35   : > { %s865_s14 = scalar_lea.hbm %s1225_s0, 512  ;;  %p866_p7 = scmp.lt.u32.totalorder %s1100_s9, %s1225_s0 }
  0x36   : > { %p863_p3 = pnand %p862_p0, %p861_p13  ;;  %p867_p9 = scmp.lt.u32.totalorder %s865_s14, %s860_s11 }
  0x37   : > { %p869_p1 = scmp.lt.u32.totalorder %s860_s11, %s1100_s9 }
  0x38   : > { %p864_p5 = pneg %p863_p3  ;;  %p868_p2 = por %p867_p9, %p866_p7 }
  0x3a   : > { %p870_p4 = por %p869_p1, %p868_p2 }
  0x3c   : > { %p871_p6 = pnand %p870_p4, %p864_p5 }
  0x3e   : > { %874 = shalt.err (!%p871_p6)
}
  0x3f   : > { %s875_s5 = scalar_lea.vmem %s1106_s29, 256  ;;  %s965_s6 = smov [#allocation4]  }
  0x40   : > { %p876_p8 = scmp.ne.s32.totalorder %s1106_s29, %s875_s5  ;;  %s880_s7 = sshll.u32 %s965_s6, 4  ;;  %s881_s7 = int_to_ptr.vmem [resolvable:$false] %s880_s7 }
  0x41   : > { %s882_s27 = scalar_lea.vmem %s881_s7, 512  ;;  %p883_p3 = scmp.lt.s32.totalorder %s1106_s29, %s881_s7 }
  0x42   : > { %p878_p10 = pnand %p876_p8, %p862_p0  ;;  %p884_p7 = scmp.lt.s32.totalorder %s882_s27, %s875_s5 }
  0x44   : > { %p879_p13 = pneg %p878_p10  ;;  %p885_p9 = por %p884_p7, %p883_p3 }
  0x46   : > { %p886_p2 = pnand %p885_p9, %p879_p13 }
  0x48   : > { %889 = shalt.err (!%p886_p2)
}
  0x49   : > { %s966_s8 = smov 128   ;;  %s967_s26 = smov 8  }
  0x4a   : > { %783 = dma.hbm_to_vmem [thread:$0]  (!%p1102_p11), %s1100_s9, 256, %s1106_s29, %s1108_s10, %s966_s8, %s966_s8, %s967_s26  }
  0x4b   : > { %p1240_p0 = scmp.ne.s32.totalorder %s1235_s24, 0 }
  0x4c   : > { %s1139_s11 = sand.u32 (!%p1240_p0), 1, %s952_s18   ;;  %p1241_p5 = scmp.ne.s32.totalorder (!%p1240_p0), %s1233_s22, 0 }
  0x4d   : > { %197 = sbr.rel (%p1240_p0) target bundleno = 361 (0x169), region = 36  ;;  %s688_s12 = sshll.u32 (!%p1240_p0), %s1139_s11, 4 }
  0x4e   : > { %s200_s13 = scalar_lea.sflag (!%p1240_p0), [#allocation5], %s1139_s11  ;;  %s1143_s14 = scalar_lea.vmem (!%p1240_p0), [#allocation4], %s688_s12 }
  0x54   : > { %935 = dma.done.wait (%p1241_p5), %s200_s13, 256  }
  0x55   : > { %937 = vsyncadd (%p1241_p5), %s200_s13, 4294967040  ;;  %p1242_p11 = scmp.eq.s32.totalorder %s1021_s3, 0 }
  0x57   : > { %939 = dma.done.wait (%p1242_p11), [#allocation8], 6144   ;;  %p1243_p1 = pmov %p1242_p11 }
  0x58   : > { %vm232_vm0 = vcmask 516096   ;;  %v968_v0 = vmov 0.0   ;;  %v262_v1 = vld [vmem:[#allocation7 + $0x88] sm:$0xff]  ;;  %v264_v2 = vld [vmem:[#allocation7 + $0x98] sm:$0xff]  ;;  %v261_v6 = vld [vmem:[#allocation7 + $0x80] sm:$0xff]  ;;  %vm237_vm1 = vcmask 523264  }
  0x59   : > { %941 = vsyncadd (%p1243_p1), [#allocation8], 4294961152  ;;  %233 = vst.msk [vmem:[#allocation2] sm:$0x1] %vm232_vm0, %v968_v0  ;;  %347 = vmatprep.mubr.f32.mxu1 %v968_v0  ;;  %430 = vmatprep.mubr.f32.mxu0 %v968_v0  ;;  %v243_v3 = vld [vmem:[#allocation7 + $0x8] sm:$0xff]  ;;  %v704_v4 = vpack.c.bf16 %v264_v2, %v262_v1  ;;  %v245_v5 = vld [vmem:[#allocation7 + $0x18] sm:$0xff] }
  0x5a   : > { %234 = vst.msk [vmem:[#allocation2 + $0x11] sm:$0x1] %vm232_vm0, %v968_v0  ;;  %v263_v7 = vld [vmem:[#allocation7 + $0x90] sm:$0xff]  ;;  %v720_v8 = vpack.c.bf16 %v245_v5, %v243_v3  ;;  %v242_v10 = vld [vmem:[#allocation7] sm:$0xff]  ;;  %v266_v12 = vld [vmem:[#allocation7 + $0xa8] sm:$0xff]  ;;  %s565_s22 = sld [smem:[#allocation3]] }
  0x5b   : > { %v706_v9 = vpack.c.bf16 %v263_v7, %v261_v6  ;;  %v244_v11 = vld [vmem:[#allocation7 + $0x10] sm:$0xff]  ;;  %705 = vmatprep.subr.bf16.mxu1 %v704_v4  ;;  %v268_v14 = vld [vmem:[#allocation7 + $0xb8] sm:$0xff]  ;;  %v247_v15 = vld [vmem:[#allocation7 + $0x28] sm:$0xff]  ;;  %s690_s29 = sshll.u32 %s1139_s11, 5  ;;  %s703_s15 = sshll.u32 %s1021_s3, 9 }
  0x5c   : > { %v722_v13 = vpack.c.bf16 %v244_v11, %v242_v10  ;;  %v249_v16 = vld [vmem:[#allocation7 + $0x38] sm:$0xff]  ;;  %721 = vmatprep.subr.bf16.mxu0 %v720_v8  ;;  %v708_v17 = vpack.c.bf16 %v268_v14, %v266_v12  ;;  %v265_v19 = vld [vmem:[#allocation7 + $0xa0] sm:$0xff]  ;;  %v267_v20 = vld [vmem:[#allocation7 + $0xb0] sm:$0xff]  ;;  %s231_s30 = scalar_lea.vmem [#allocation9], %s690_s29  ;;  %s1181_s3 = scalar_lea.hbm %s1229_s4, %s703_s15 }
  0x5d   : > { %707 = vmatpush1.bf16.msra.mxu1 %v706_v9  ;;  %v724_v18 = vpack.c.bf16 %v249_v16, %v247_v15  ;;  %v246_v21 = vld [vmem:[#allocation7 + $0x20] sm:$0xff]  ;;  %v710_v22 = vpack.c.bf16 %v267_v20, %v265_v19  ;;  %v248_v23 = vld [vmem:[#allocation7 + $0x30] sm:$0xff]  ;;  %v270_v24 = vld [vmem:[#allocation7 + $0xc8] sm:$0xff]  ;;  %v551_v20 = vlaneseq  ;;  %s597_s10 = sshll.u32 %s231_s30, 4  ;;  %s584_s6 = scalar_lea.sflag [#allocation6], %s1139_s11  ;;  %s1176_s10 = int_to_ptr.vmem [resolvable:$true] %s597_s10 }
  0x5e   : > { %723 = vmatpush1.bf16.msra.mxu0 %v722_v13  ;;  %v272_v25 = vld [vmem:[#allocation7 + $0xd8] sm:$0xff]  ;;  %709 = vmatprep.subr.bf16.mxu1 %v708_v17  ;;  %v726_v26 = vpack.c.bf16 %v248_v23, %v246_v21  ;;  %v251_v28 = vld [vmem:[#allocation7 + $0x48] sm:$0xff]  ;;  %v269_v30 = vld [vmem:[#allocation7 + $0xc0] sm:$0xff]  ;;  %s890_s7 = scalar_lea.vmem %s1176_s10, 512  ;;  %s969_s27 = smov [#allocation9]  }
  0x5f   : > { %725 = vmatprep.subr.bf16.mxu0 %v724_v18  ;;  %v712_v27 = vpack.c.bf16 %v272_v25, %v270_v24  ;;  %v253_v29 = vld [vmem:[#allocation7 + $0x58] sm:$0xff]  ;;  %v271_v32 = vld [vmem:[#allocation7 + $0xd0] sm:$0xff]  ;;  %v250_v33 = vld [vmem:[#allocation7 + $0x40] sm:$0xff]  ;;  %p891_p4 = scmp.ne.s32.totalorder %s1176_s10, %s890_s7  ;;  %s894_s8 = sshll.u32 %s969_s27, 4  ;;  %s895_s8 = int_to_ptr.vmem [resolvable:$false] %s894_s8 }
  0x60   : > { %v728_v31 = vpack.c.bf16 %v253_v29, %v251_v28  ;;  %v252_v34 = vld [vmem:[#allocation7 + $0x50] sm:$0xff]  ;;  %v714_v35 = vpack.c.bf16 %v271_v32, %v269_v30  ;;  %v274_v36 = vld [vmem:[#allocation7 + $0xe8] sm:$0xff]  ;;  %v276_v37 = vld [vmem:[#allocation7 + $0xf8] sm:$0xff]  ;;  %s896_s26 = scalar_lea.vmem %s895_s8, 1024  ;;  %p897_p10 = scmp.lt.s32.totalorder %s1176_s10, %s895_s8 }
  0x61   : > { %711 = vmatpush1.bf16.msra.mxu1 %v710_v22  ;;  %v255_v38 = vld [vmem:[#allocation7 + $0x68] sm:$0xff]  ;;  %v730_v39 = vpack.c.bf16 %v252_v34, %v250_v33  ;;  %v716_v40 = vpack.c.bf16 %v276_v37, %v274_v36  ;;  %v257_v41 = vld [vmem:[#allocation7 + $0x78] sm:$0xff]  ;;  %v273_v42 = vld [vmem:[#allocation7 + $0xe0] sm:$0xff]  ;;  %v570_v37 = vstv %s565_s22  ;;  %p892_p6 = pnand %p891_p4, %p1091_p12  ;;  %p898_p13 = scmp.lt.s32.totalorder %s896_s26, %s890_s7 }
  0x62   : > { %727 = vmatpush1.bf16.msra.mxu0 %v726_v26  ;;  %713 = vmatprep.subr.bf16.mxu1 %v712_v27  ;;  %v275_v43 = vld [vmem:[#allocation7 + $0xf0] sm:$0xff]  ;;  %v732_v44 = vpack.c.bf16 %v257_v41, %v255_v38  ;;  %v254_v45 = vld [vmem:[#allocation7 + $0x60] sm:$0xff]  ;;  %v236_v48 = vld [vmem:[%s1143_s14 + $0x8] sm:$0xff]  ;;  %v552_v26 = vshrl.u32 %v551_v20, 7 }
  0x63   : > { %729 = vmatprep.subr.bf16.mxu0 %v728_v31  ;;  %v256_v46 = vld [vmem:[#allocation7 + $0x70] sm:$0xff]  ;;  %v447_v49 = vld [vmem:[#allocation7 + $0x108] sm:$0xff]  ;;  %v449_v50 = vld [vmem:[#allocation7 + $0x118] sm:$0xff]  ;;  %v718_v51 = vpack.c.bf16 %v275_v43, %v273_v42  ;;  %239 = vst.msk [vmem:[#allocation2 + $0x9] sm:$0xff] %vm237_vm1, %v236_v48  ;;  %p893_p8 = pneg %p892_p6  ;;  %p899_p3 = por %p898_p13, %p897_p10 }
  0x64   : > { %v235_v47 = vld [vmem:[%s1143_s14] sm:$0xff]  ;;  %v734_v52 = vpack.c.bf16 %v256_v46, %v254_v45  ;;  %v736_v53 = vpack.c.bf16 %v449_v50, %v447_v49  ;;  %v451_v56 = vld [vmem:[#allocation7 + $0x128] sm:$0xff]  ;;  %v453_v57 = vld [vmem:[#allocation7 + $0x138] sm:$0xff]  ;;  %v553_v27 = vsub.s32 0, %v552_v26  ;;  %v557_v29 = vsub.s32 1, %v552_v26 }
  0x65   : > { %238 = vst.msk [vmem:[#allocation2 + $0x1] sm:$0xff] %vm237_vm1, %v235_v47  ;;  %715 = vmatpush1.bf16.msra.mxu1 %v714_v35  ;;  %v446_v54 = vld [vmem:[#allocation7 + $0x100] sm:$0xff]  ;;  %v448_v55 = vld [vmem:[#allocation7 + $0x110] sm:$0xff]  ;;  %v740_v59 = vpack.c.bf16 %v453_v57, %v451_v56  ;;  %v455_v62 = vld [vmem:[#allocation7 + $0x148] sm:$0xff]  ;;  %p900_p7 = pnand %p899_p3, %p893_p8 }
  0x66   : > { %731 = vmatpush1.bf16.msra.mxu0 %v730_v39  ;;  %717 = vmatprep.subr.bf16.mxu1 %v716_v40  ;;  %v738_v58 = vpack.c.bf16 %v448_v55, %v446_v54  ;;  %v450_v60 = vld [vmem:[#allocation7 + $0x120] sm:$0xff]  ;;  %v452_v61 = vld [vmem:[#allocation7 + $0x130] sm:$0xff]  ;;  %v457_v2 = vld [vmem:[#allocation7 + $0x158] sm:$0xff] }
  0x67   : > { %733 = vmatprep.subr.bf16.mxu0 %v732_v44  ;;  %v742_v3 = vpack.c.bf16 %v452_v61, %v450_v60  ;;  %v744_v5 = vpack.c.bf16 %v457_v2, %v455_v62  ;;  %v454_v6 = vld [vmem:[#allocation7 + $0x140] sm:$0xff]  ;;  %v456_v7 = vld [vmem:[#allocation7 + $0x150] sm:$0xff]  ;;  %v459_v9 = vld [vmem:[#allocation7 + $0x168] sm:$0xff] }
  0x68   : > { %v461_v10 = vld [vmem:[#allocation7 + $0x178] sm:$0xff]  ;;  %v746_v11 = vpack.c.bf16 %v456_v7, %v454_v6  ;;  %v458_v13 = vld [vmem:[#allocation7 + $0x160] sm:$0xff]  ;;  %v460_v14 = vld [vmem:[#allocation7 + $0x170] sm:$0xff] }
  0x69   : > { %719 = vmatpush1.bf16.msra.mxu1 %v718_v51  ;;  %v748_v12 = vpack.c.bf16 %v461_v10, %v459_v9  ;;  %v750_v15 = vpack.c.bf16 %v460_v14, %v458_v13  ;;  %v549_v28 = vld [vmem:[%s1227_s2] sm:$0x3] }
  0x6a   : > { %735 = vmatpush1.bf16.msra.mxu0 %v734_v52  ;;  %752 = vmatprep.subr.bf16.mxu1 %v736_v53  ;;  %v259_v4 = vld [vmem:[#allocation2 + $0x9] sm:$0xff]  ;;  %v554_v30 = vrot.slane %v549_v28, %v553_v27  ;;  %v558_v32 = vrot.slane %v549_v28, %v557_v29 }
  0x6b   : > { %737 = vmatprep.subr.bf16.mxu0 %v736_v53  ;;  %v444_v16 = vld [vmem:[#allocation2 + $0xa] sm:$0xff] }
  0x6c   : > { %v258_v63 = vld [vmem:[#allocation2 + $0x1] sm:$0xff] }
  0x6d   : > { %v240_v1 = vld [vmem:[#allocation2] sm:$0xff]  ;;  %691 = vmatmul.mubr.msk.f32.vlgmr.msra.gmra.mrb[0].mxu1 %vm237_vm1, %v258_v63  ;;  %v241_v8 = vld [vmem:[#allocation2 + $0x8] sm:$0xff] }
  0x6e   : > { %693 = vmatmul.mubr.msk.f32.vlgmr.msra.gmra.mrb[0].mxu0 %vm237_vm1, %v240_v1  ;;  %756 = vmatpush1.bf16.msra.mxu1 %v738_v58  ;;  %v443_v17 = vld [vmem:[#allocation2 + $0x2] sm:$0xff] }
  0x6f   : > { %739 = vmatpush1.bf16.msra.mxu0 %v738_v58  ;;  %753 = vmatprep.subr.bf16.mxu1 %v740_v59 }
  0x70   : > { %741 = vmatprep.subr.bf16.mxu0 %v740_v59  ;;  %353 = vmatprep.mubr.f32.mxu1 %v968_v0 }
  0x71   : > { %436 = vmatprep.mubr.f32.mxu0 %v968_v0  ;;  %692 = vmatmul.mubr.msk.f32.gmra.mrb[2].mxu1 %vm237_vm1, %v259_v4 }
  0x72   : > { %757 = vmatpush1.bf16.msra.mxu1 %v742_v3  ;;  %694 = vmatmul.mubr.msk.f32.gmra.mrb[2].mxu0 %vm237_vm1, %v241_v8 }
  0x73   : > { %743 = vmatpush1.bf16.msra.mxu0 %v742_v3  ;;  %754 = vmatprep.subr.bf16.mxu1 %v744_v5 }
  0x74   : > { %745 = vmatprep.subr.bf16.mxu0 %v744_v5  ;;  %532 = vmatprep.mubr.f32.mxu0 %v968_v0 }
  0x75   : > { %538 = vmatprep.mubr.f32.mxu1 %v968_v0 }
  0x76   : > { %758 = vmatpush1.bf16.msra.mxu1 %v746_v11 }
  0x77   : > { %747 = vmatpush1.bf16.msra.mxu0 %v746_v11  ;;  %755 = vmatprep.subr.bf16.mxu1 %v748_v12 }
  0x78   : > { %749 = vmatprep.subr.bf16.mxu0 %v748_v12 }
  0x7a   : > { %759 = vmatpush1.bf16.msra.mxu1 %v750_v15 }
  0x7b   : > { %751 = vmatpush1.bf16.msra.mxu0 %v750_v15 }
  0x7d   : > { %696 = vmatmul.mubr.msk.f32.vlgmr.msra.gmra.mrb[4].mxu1 %vm237_vm1, %v444_v16 }
  0x7e   : > { %695 = vmatmul.mubr.msk.f32.vlgmr.msra.gmra.mrb[0].mxu0 %vm237_vm1, %v443_v17 }
 0x140   : > { %v349_v18 = vpop.f32.mrb[0].mxu1 }
 0x141   : > { %v351_v19 = vpop.f32.mrb[1].mxu1 }
 0x144   : > { %v355_v21 = vpop.f32.mrb[2].mxu1 }
 0x145   : > { %v438_v22 = vpop.f32.mrb[2].mxu0  ;;  %v357_v0 = vpop.f32.mrb[3].mxu1 }
 0x146   : > { %v439_v23 = vadd.f32 %v438_v22, %v355_v21  ;;  %v440_v24 = vpop.f32.mrb[3].mxu0 }
 0x147   : > { %v441_v25 = vadd.f32 %v440_v24, %v357_v0 }
 0x150   : > { %v540_v31 = vpop.f32.mrb[4].mxu1 }
 0x151   : > { %v534_v33 = vpop.f32.mrb[0].mxu0  ;;  %v547_v34 = vadd.f32 %v540_v31, %v439_v23  ;;  %v542_v35 = vpop.f32.mrb[5].mxu1 }
 0x152   : > { %v760_v36 = vadd.f32 %v534_v33, %v349_v18  ;;  %v536_v38 = vpop.f32.mrb[1].mxu0  ;;  %v548_v39 = vadd.f32 %v542_v35, %v441_v25 }
 0x153   : > { %v563_v40 = vadd.f32 %v554_v30, %v547_v34  ;;  %v761_v41 = vadd.f32 %v536_v38, %v351_v19 }
 0x154   : > { %v561_v42 = vadd.f32 %v760_v36, %v554_v30  ;;  %v564_v43 = vadd.f32 %v558_v32, %v548_v39 }
 0x155   : > { %vm568_vm2 = vcmp.ge.f32.partialorder %v563_v40, 0.0  ;;  %v573_v44 = vmul.f32 %v570_v37, %v563_v40  ;;  %v562_v45 = vadd.f32 %v761_v41, %v558_v32 }
 0x156   : > { %vm566_vm3 = vcmp.ge.f32.partialorder %v561_v42, 0.0  ;;  %v571_v46 = vmul.f32 %v570_v37, %v561_v42  ;;  %vm569_vm4 = vcmp.ge.f32.partialorder %v564_v43, 0.0  ;;  %v574_v47 = vmul.f32 %v570_v37, %v564_v43 }
 0x157   : > { %v577_v48 = vsel %vm568_vm2, %v563_v40, %v573_v44  ;;  %vm567_vm5 = vcmp.ge.f32.partialorder %v562_v45, 0.0  ;;  %v572_v49 = vmul.f32 %v570_v37, %v562_v45 }
 0x158   : > { %v575_v50 = vsel %vm566_vm3, %v561_v42, %v571_v46  ;;  %581 = vst [vmem:[%s231_s30 + $0x10] sm:$0xff] %v577_v48  ;;  %v578_v51 = vsel %vm569_vm4, %v564_v43, %v574_v47 }
 0x159   : > { %579 = vst [vmem:[%s231_s30] sm:$0xff] %v575_v50  ;;  %v576_v52 = vsel %vm567_vm5, %v562_v45, %v572_v49  ;;  %582 = vst [vmem:[%s231_s30 + $0x18] sm:$0xff] %v578_v51 }
 0x15a   : > { %580 = vst [vmem:[%s231_s30 + $0x8] sm:$0xff] %v576_v52 }
 0x15b   : > { %903 = shalt.err (!%p900_p7)
}
 0x15c   : > { %s904_s12 = scalar_lea.hbm %s1181_s3, 512  ;;  %s908_s22 = scalar_lea.hbm %s1229_s4, 1024 }
 0x15d   : > { %p905_p9 = scmp.ne.s32.totalorder %s1181_s3, %s904_s12  ;;  %p909_p5 = scmp.lt.u32.totalorder %s1181_s3, %s1229_s4 }
 0x15e   : > { %p910_p11 = scmp.lt.u32.totalorder %s908_s22, %s904_s12  ;;  %p912_p4 = scmp.lt.u32.totalorder %s904_s12, %s1181_s3 }
 0x15f   : > { %p906_p2 = pnand %p905_p9, %p1091_p12 }
 0x160   : > { %p911_p1 = por %p910_p11, %p909_p5 }
 0x161   : > { %p907_p0 = pneg %p906_p2 }
 0x162   : > { %p913_p6 = por %p912_p4, %p911_p1 }
 0x164   : > { %p914_p8 = pnand %p913_p6, %p907_p0 }
 0x166   : > { %917 = shalt.err (!%p914_p8)
}
 0x167   : > { %s970_s29 = smov 256   ;;  %s971_s30 = smov 16  }
 0x168   : > { %774 = dma.vmem_to_hbm [thread:$0]  (%p1091_p12), %s1176_s10, 512, %s1181_s3, %s584_s6, %s970_s29, %s970_s29, %s971_s30  }
 0x169 PF: > { %s612_s15 = sand.u32 1, %s948_s17   ;;  %p1244_p10 = scmp.ne.s32.totalorder %s1234_s23, 0 }
 0x16a   : > { %p1245_p13 = scmp.ge.s32.totalorder %s960_s20, 2  ;;  %s613_s16 = scalar_lea.sflag [#allocation6], %s612_s15 }
 0x16c   : > { %p785_p3 = pnand %p1245_p13, %p1244_p10 }
 0x16e   : > { %943 = dma.done.wait (!%p785_p3), %s613_s16, 512  }
 0x16f   : > { %945 = vsyncadd (!%p785_p3), %s613_s16, 4294966784  ;;  %p19_p7 = scmp.ge.s32.totalorder %s1056_s28, 4   ;;  %s1246_s17 = smov %s952_s18 }
 0x170   : > { %s1247_s18 = smov %s956_s19  ;;  %s1248_s19 = smov %s1087_s21 }
 0x171   : > { %s1249_s20 = smov %s1056_s28  ;;  %21 = sbr.rel (!%p19_p7) target bundleno = 8 (0x8), region = 87 }
 0x178   :  { %618 = vsyncpa [#allocation5], 1 }
 0x179   :  { %620 = vsyncpa [#allocation5 + $0x1], 1 }
 0x17a   :  { %621 = vsyncpa [#allocation8], 1 }
 0x17b   :  { %622 = vsyncpa [#allocation6], 1 }
 0x17c   :  { %624 = vsyncpa [#allocation6 + $0x1], 1 }

</bundles_post_ra>
